<compile_context>
chip_gen: v7x
topology: tpu7x:2x2x1
jax: 0.10.0
libtpu: 0.0.40
codegen_flags: <defaults>
</compile_context>

<pallas_src>
import functools

import jax
import jax.numpy as jnp
from jax.experimental import pallas as pl
from jax.experimental.pallas import tpu as pltpu


def _round_up(a, b):
    return (a + b - 1) // b * b


def _gcn_agg_kernel(adj_ref, h_ref, out_ref, acc_ref, *, n_cols, tk, mask_k):
    """Accumulate out[i-tile] += adj[i-tile, k-tile] @ h[k-tile] in f32."""
    k = pl.program_id(1)

    @pl.when(k == 0)
    def _():
        acc_ref[...] = jnp.zeros_like(acc_ref)

    a = adj_ref[...]
    if mask_k:
        # The last K tile reads past adj's column extent (we never pad adj in
        # HBM); zero those columns so garbage never reaches the MXU sum.
        col = k * tk + jax.lax.broadcasted_iota(jnp.int32, a.shape, 1)
        a = jnp.where(col < n_cols, a, jnp.zeros_like(a))

    acc_ref[...] += jnp.dot(a, h_ref[...], preferred_element_type=jnp.float32)

    @pl.when(k == pl.num_programs(1) - 1)
    def _():
        out_ref[...] = acc_ref[...].astype(out_ref.dtype)


def _derive_tiles(n, cout_p, in_itemsize, out_itemsize):
    """Per-generation tile sizes and VMEM limit."""
    try:
        info = pltpu.get_tpu_info()
        vmem_cap = getattr(info, "vmem_capacity_bytes", 64 * 1024 * 1024)
    except Exception:
        vmem_cap = 64 * 1024 * 1024  # conservative (v7x-like) fallback

    if vmem_cap >= 96 * 1024 * 1024:        # v5e / v6e: 128 MiB physical VMEM
        vmem_limit = 100 * 1024 * 1024
        tm, tk = 512, 512
    else:                                   # v7x: 64 MiB physical VMEM
        vmem_limit = 48 * 1024 * 1024
        tm, tk = 256, 512

    # Clip to problem size while staying (8, 128)-legal.
    tm = min(tm, _round_up(n, 8))
    tk = min(tk, _round_up(n, 128))

    budget = int(vmem_limit * 0.75)

    def footprint(tm_, tk_):
        return (2 * tm_ * tk_ * in_itemsize          # adj tile, double-buffered
                + 2 * tk_ * cout_p * in_itemsize     # h tile,   double-buffered
                + tm_ * cout_p * 4                   # f32 accumulator scratch
                + 2 * tm_ * cout_p * out_itemsize)   # out tile,  double-buffered

    while footprint(tm, tk) > budget and (tm > 8 or tk > 128):
        if tk >= tm and tk > 128:
            tk = max(128, ((tk // 2) // 128) * 128)
        else:
            tm = max(8, ((tm // 2) // 8) * 8)
    return tm, tk, vmem_limit


def gcn_forward(x, adj, weight, bias=None, *, compute_dtype=jnp.bfloat16,
                row_tile=None, k_tile=None):
    """GraphConvolutionLayer forward: adj @ (x @ weight.T + bias).

    x: [N, Cin], adj: [N, N], weight: [Cout, Cin], bias: [Cout] -> [N, Cout]

    compute_dtype: dtype the streamed operands (adj, h) are fed to the MXU in.
        bf16 (default) halves the dominant N^2 adj HBM traffic; accumulation
        is always f32. Use jnp.float32 for tighter numerics.
    row_tile / k_tile: optional tile overrides (rounded to 8 / 128).
    """
    N, Cin = x.shape
    Cout, Cin_w = weight.shape
    assert Cin_w == Cin and adj.shape == (N, N)
    out_dtype = x.dtype
    if compute_dtype is None:
        compute_dtype = jnp.float32

    # ---- Feature transform precomputed once in plain XLA (bias math in f32).
    h = jnp.dot(x.astype(jnp.float32), weight.T.astype(jnp.float32),
                precision="highest")                      # [N, Cout]
    if bias is not None:
        h = h + bias.astype(jnp.float32)[None, :]

    # ---- Lane-dense output: pad Cout up to a multiple of 128 (zero cols).
    cout_p = _round_up(max(Cout, 128), 128)

    in_itemsize = jnp.dtype(compute_dtype).itemsize
    out_itemsize = jnp.dtype(out_dtype).itemsize
    tm, tk, vmem_limit = _derive_tiles(N, cout_p, in_itemsize, out_itemsize)
    if row_tile is not None:
        tm = max(8, _round_up(min(row_tile, _round_up(N, 8)), 8))
    if k_tile is not None:
        tk = max(128, _round_up(min(k_tile, _round_up(N, 128)), 128))

    grid_m = pl.cdiv(N, tm)
    grid_k = pl.cdiv(N, tk)
    k_pad = grid_k * tk  # padded K extent for h only; adj is NOT padded.

    # h is small (N x Cp): zero-pad K rows + Cout cols, downcast for streaming.
    h = jnp.pad(h, ((0, k_pad - N), (0, cout_p - Cout))).astype(compute_dtype)
    adj_c = adj.astype(compute_dtype)

    kernel = functools.partial(_gcn_agg_kernel, n_cols=N, tk=tk,
                               mask_k=(N % tk) != 0)

    flops = 2 * N * N * cout_p
    bytes_accessed = (N * N * in_itemsize                      # adj, once
                      + grid_m * k_pad * cout_p * in_itemsize  # h per row tile
                      + N * cout_p * out_itemsize)             # output

    out = pl.pallas_call(
        kernel,
        out_shape=jax.ShapeDtypeStruct((N, cout_p), out_dtype),
        grid=(grid_m, grid_k),                                 # reduction last
        in_specs=[
            pl.BlockSpec((tm, tk), lambda i, k: (i, k)),       # adj (streamed)
            pl.BlockSpec((tk, cout_p), lambda i, k: (k, 0)),   # h   (k-tiled)
        ],
        out_specs=pl.BlockSpec((tm, cout_p), lambda i, k: (i, 0)),
        scratch_shapes=[pltpu.VMEM((tm, cout_p), jnp.float32)],
        compiler_params=pltpu.CompilerParams(
            dimension_semantics=("parallel", "arbitrary"),
            vmem_limit_bytes=vmem_limit,
        ),
        cost_estimate=pl.CostEstimate(flops=flops, transcendentals=0,
                                      bytes_accessed=bytes_accessed),
    )(adj_c, h)

    # Slice off the lane padding (all N rows are valid).
    return out[:, :Cout]


def xavier_uniform(key, shape):
    # torch.nn.init.xavier_uniform_ for a Linear weight [fan_out, fan_in]
    fan_out, fan_in = shape
    bound = (6.0 / (fan_in + fan_out)) ** 0.5
    return jax.random.uniform(key, shape, jnp.float32, -bound, bound)


def _make_inputs(key, n, cin, cout):
    k_x, k_adj, k_w, k_b = jax.random.split(key, 4)
    x = jax.random.normal(k_x, (n, cin), jnp.float32)
    a = jax.random.uniform(k_adj, (n, n), jnp.float32)
    a = (a + a.T) * 0.5 + jnp.eye(n, dtype=jnp.float32)
    adj = a / jnp.sum(a, axis=1, keepdims=True)        # row-normalized adjacency
    weight = xavier_uniform(k_w, (cout, cin))
    b_bound = 1.0 / (cin ** 0.5)
    bias = jax.random.uniform(k_b, (cout,), jnp.float32, -b_bound, b_bound)
    return x, adj, weight, bias


def _reference(x, adj, weight, bias):
    h = jnp.dot(x, weight.T, precision="highest") + bias
    return jnp.dot(adj, h, precision="highest")


if __name__ == "__main__":
    key = jax.random.PRNGKey(0)
    k1, k2 = jax.random.split(key)

    # --- Test 1: module-sized shapes, default bf16 streaming path. ---------
    N, Cin, Cout = 8, 4, 32
    x, adj, weight, bias = _make_inputs(k1, N, Cin, Cout)
    ref = _reference(x, adj, weight, bias)

    out_bf16 = jax.block_until_ready(gcn_forward(x, adj, weight, bias))
    assert out_bf16.shape == (N, Cout)
    assert jnp.allclose(out_bf16, ref, atol=5e-2, rtol=5e-2)

    # --- Test 2: same shapes, f32 streaming path (tighter numerics). -------
    out_f32 = jax.block_until_ready(
        gcn_forward(x, adj, weight, bias, compute_dtype=jnp.float32))
    assert out_f32.shape == (N, Cout)
    assert jnp.allclose(out_f32, ref, atol=2e-2, rtol=2e-2)

    # --- Test 3: exercise multi-tile grid + K-boundary masking. ------------
    N2, Cin2, Cout2 = 200, 16, 40
    x2, adj2, weight2, bias2 = _make_inputs(k2, N2, Cin2, Cout2)
    ref2 = _reference(x2, adj2, weight2, bias2)
    out2 = jax.block_until_ready(
        gcn_forward(x2, adj2, weight2, bias2, row_tile=64, k_tile=128))
    assert out2.shape == (N2, Cout2)
    assert jnp.allclose(out2, ref2, atol=5e-2, rtol=5e-2)

    print("KERNEL_OK")
</pallas_src>

<mosaic_0001>
module attributes {stable_mosaic.version = 11 : i64} {
  func.func @_gcn_agg_kernel(%arg0: i32, %arg1: i32, %arg2: memref<8x128xbf16, #tpu.memory_space<vmem>>, %arg3: memref<128x128xbf16, #tpu.memory_space<vmem>>, %arg4: memref<8x128xf32, #tpu.memory_space<vmem>>, %arg5: memref<8x128xf32, #tpu.memory_space<vmem>>) attributes {dimension_semantics = [#tpu.dimension_semantics<parallel>, #tpu.dimension_semantics<arbitrary>], iteration_bounds = array<i64: 1, 1>, scalar_prefetch = 0 : i64, scratch_operands = 1 : i64, tpu.core_type = #tpu.core_type<tc>, window_params = [{transform_indices = @transform_0, window_bounds = array<i64: 8, 128>}, {transform_indices = @transform_1, window_bounds = array<i64: 128, 128>}, {transform_indices = @transform_2, window_bounds = array<i64: 8, 128>}]} {
    %c0_i32 = arith.constant 0 : i32
    %0 = arith.cmpi eq, %arg1, %c0_i32 : i32
    %1 = arith.extui %0 : i1 to i32
    %c0_i32_0 = arith.constant 0 : i32
    %2 = arith.cmpi ne, %1, %c0_i32_0 : i32
    scf.if %2 {
      %cst_11 = arith.constant 0.000000e+00 : f32
      %20 = vector.broadcast %cst_11 : f32 to vector<8x128xf32>
      %c0_12 = arith.constant 0 : index
      %c0_13 = arith.constant 0 : index
      %21 = vector.load %arg5[%c0_12, %c0_13] : memref<8x128xf32, #tpu.memory_space<vmem>>, vector<8x128xf32>
      tpu.vector_store %arg5[%c0_12, %c0_13], %20 {strides = array<i32>} : memref<8x128xf32, #tpu.memory_space<vmem>>, vector<8x128xf32>,
    } else {
    }
    %c0 = arith.constant 0 : index
    %c0_1 = arith.constant 0 : index
    %3 = vector.load %arg2[%c0, %c0_1] : memref<8x128xbf16, #tpu.memory_space<vmem>>, vector<8x128xbf16>
    %c128_i32 = arith.constant 128 : i32
    %4 = arith.muli %arg1, %c128_i32 : i32
    %5 = tpu.iota {dimensions = array<i32: 1>} : vector<8x128xi32>
    %6 = vector.broadcast %4 : i32 to vector<8x128xi32>
    %7 = arith.addi %6, %5 : vector<8x128xi32>
    %c8_i32 = arith.constant 8 : i32
    %8 = vector.broadcast %c8_i32 : i32 to vector<8x128xi32>
    %9 = arith.cmpi slt, %7, %8 : vector<8x128xi32>
    %cst = arith.constant 0.000000e+00 : bf16
    %10 = vector.broadcast %cst : bf16 to vector<8x128xbf16>
    %11 = arith.select %9, %3, %10 : vector<8x128xi1>, vector<8x128xbf16>
    %c0_2 = arith.constant 0 : index
    %c0_3 = arith.constant 0 : index
    %12 = vector.load %arg5[%c0_2, %c0_3] : memref<8x128xf32, #tpu.memory_space<vmem>>, vector<8x128xf32>
    %c0_4 = arith.constant 0 : index
    %c0_5 = arith.constant 0 : index
    %13 = vector.load %arg3[%c0_4, %c0_5] : memref<128x128xbf16, #tpu.memory_space<vmem>>, vector<128x128xbf16>
    %cst_6 = arith.constant dense<0.000000e+00> : vector<8x128xf32>
    %14 = tpu.matmul %11, %13, %cst_6 {dimension_numbers = #tpu.dot_dimension_numbers<[1], [0], [0], [1], [0, 0, 1, 1], [], []>} : vector<8x128xbf16>, vector<128x128xbf16>, vector<8x128xf32> -> vector<8x128xf32>
    %15 = arith.addf %12, %14 : vector<8x128xf32>
    %c0_7 = arith.constant 0 : index
    %c0_8 = arith.constant 0 : index
    %16 = vector.load %arg5[%c0_7, %c0_8] : memref<8x128xf32, #tpu.memory_space<vmem>>, vector<8x128xf32>
    tpu.vector_store %arg5[%c0_7, %c0_8], %15 {strides = array<i32>} : memref<8x128xf32, #tpu.memory_space<vmem>>, vector<8x128xf32>,
    %c0_i32_9 = arith.constant 0 : i32
    %17 = arith.cmpi eq, %arg1, %c0_i32_9 : i32
    %18 = arith.extui %17 : i1 to i32
    %c0_i32_10 = arith.constant 0 : i32
    %19 = arith.cmpi ne, %18, %c0_i32_10 : i32
    scf.if %19 {
      %c0_11 = arith.constant 0 : index
      %c0_12 = arith.constant 0 : index
      %20 = vector.load %arg5[%c0_11, %c0_12] : memref<8x128xf32, #tpu.memory_space<vmem>>, vector<8x128xf32>
      %c0_13 = arith.constant 0 : index
      %c0_14 = arith.constant 0 : index
      %21 = vector.load %arg4[%c0_13, %c0_14] : memref<8x128xf32, #tpu.memory_space<vmem>>, vector<8x128xf32>
      tpu.vector_store %arg4[%c0_13, %c0_14], %20 {strides = array<i32>} : memref<8x128xf32, #tpu.memory_space<vmem>>, vector<8x128xf32>,
    } else {
    }
    return
  }
  func.func @transform_0(%arg0: i32, %arg1: i32) -> (i32, i32) {
    %c0_i32 = arith.constant 0 : i32
    return %arg0, %arg1 : i32, i32
  }
  func.func @transform_1(%arg0: i32, %arg1: i32) -> (i32, i32) {
    %c0_i32 = arith.constant 0 : i32
    %c0_i32_0 = arith.constant 0 : i32
    return %arg1, %c0_i32 : i32, i32
  }
  func.func @transform_2(%arg0: i32, %arg1: i32) -> (i32, i32) {
    %c0_i32 = arith.constant 0 : i32
    %c0_i32_0 = arith.constant 0 : i32
    return %arg0, %c0_i32 : i32, i32
  }
}

</mosaic_0001>

<bundles_post_ra>
// kernel: tpu_custom_call.1
= control target key start
LH: loop header
LB: loop body
LE: loop exit
PB: predicated region body
PF: predicated region fallthrough
CT: control target
= control target key end

     0   :  { %7 = vsyncpa [#allocation4], 0  ;;  %s370_s0 = inlined_call_operand.hbm [shape: bf16[8,8], index: 0, kind: input, shape index: {}]   ;;  %s371_s1 = inlined_call_operand.hbm [shape: bf16[128,128], index: 1, kind: input, shape index: {}]   ;;  %s372_s2 = inlined_call_operand.hbm [shape: f32[8,128], index: 2, kind: output, shape index: {}]  }
   0x1   :  { %8 = vsyncpa [#allocation7], 0 }
   0x2   :  { %9 = vsyncpa [#allocation5], 0  ;;  %s305_s9 = smov [#allocation3]   ;;  %s306_s11 = smov [#allocation6]  }
   0x3   :  { %s16_s10 = sshll.u32 %s305_s9, 4  ;;  %s25_s12 = sshll.u32 %s306_s11, 4  ;;  %s17_s10 = int_to_ptr.vmem [resolvable:$true] %s16_s10  ;;  %s327_s12 = int_to_ptr.vmem [resolvable:$true] %s25_s12 }
   0x4   :  { %s233_s15 = scalar_lea.hbm %s370_s0, 64 }
   0x5   :  { %p234_p0 = scmp.ne.s32.totalorder %s370_s0, %s233_s15  ;;  %p237_p1 = scmp.lt.u32.totalorder %s233_s15, %s370_s0 }
   0x7   :  { %p239_p2 = pnand %p237_p1, %p234_p0 }
   0x9   :  { %242 = shalt.err (!%p239_p2)
}
   0xa   :  { %s243_s20 = scalar_lea.vmem %s17_s10, 64  ;;  %p248_p4 = scmp.lt.s32.totalorder %s17_s10, %s17_s10 }
   0xb   :  { %p244_p3 = scmp.ne.s32.totalorder %s17_s10, %s243_s20  ;;  %p249_p5 = scmp.lt.s32.totalorder %s243_s20, %s243_s20 }
   0xd   :  { %p250_p6 = por %p249_p5, %p248_p4 }
   0xf   :  { %p251_p7 = pnand %p250_p6, %p244_p3 }
  0x11   :  { %254 = shalt.err (!%p251_p7)
}
  0x12   :  { %19 = dma.hbm_to_vmem [thread:$0]  %s370_s0, 64, %s17_s10, [#allocation4]  }
  0x13   :  { %s255_s25 = scalar_lea.hbm %s371_s1, 1024 }
  0x14   :  { %p256_p8 = scmp.ne.s32.totalorder %s371_s1, %s255_s25  ;;  %p259_p9 = scmp.lt.u32.totalorder %s255_s25, %s371_s1 }
  0x16   :  { %p261_p10 = pnand %p259_p9, %p256_p8 }
  0x18   :  { %264 = shalt.err (!%p261_p10)
}
  0x19   :  { %s265_s30 = scalar_lea.vmem %s327_s12, 1024  ;;  %p270_p12 = scmp.lt.s32.totalorder %s327_s12, %s327_s12 }
  0x1a   :  { %p266_p11 = scmp.ne.s32.totalorder %s327_s12, %s265_s30  ;;  %p271_p13 = scmp.lt.s32.totalorder %s265_s30, %s265_s30 }
  0x1c   :  { %p272_p0 = por %p271_p13, %p270_p12 }
  0x1e   :  { %p273_p1 = pnand %p272_p0, %p266_p11 }
  0x20   :  { %276 = shalt.err (!%p273_p1)
}
  0x21   :  { %s307_s0 = smov 64   ;;  %s308_s3 = smov 4  }
  0x22   :  { %31 = dma.hbm_to_vmem [thread:$0]  %s371_s1, 1024, %s327_s12, [#allocation7], %s307_s0, %s307_s0, %s308_s3  }
  0x23   :  { %299 = dma.done.wait [#allocation4], 64  }
  0x24   :  { %300 = vsyncadd [#allocation4], 4294967232 }
  0x25   :  { %301 = dma.done.wait [#allocation7], 1024  }
  0x26   :  { %302 = vsyncadd [#allocation7], 4294966272  ;;  %v309_v0 = vmov 0.0   ;;  %vm310_vm0 = vmmov 0   ;;  %v225_v1 = vld [vmem:[#allocation6] sm:$0xff]   ;;  %v226_v2 = vld [vmem:[#allocation6 + $0x8] sm:$0xff]   ;;  %v46_v6 = vlaneseq }
  0x27   :  { %198 = vmatprep.subr.bf16.mxu0 %v309_v0  ;;  %214 = vmatprep.mubr.msk.bf16.mxu0 %vm310_vm0, %v309_v0  ;;  %v227_v3 = vld [vmem:[#allocation6 + $0x10] sm:$0xff]   ;;  %v228_v4 = vld [vmem:[#allocation6 + $0x18] sm:$0xff]   ;;  %v229_v5 = vld [vmem:[#allocation6 + $0x20] sm:$0xff]   ;;  %s311_s1 = smov [#allocation8]  }
  0x28   :  { %199 = vmatpush3.bf16.msra.mxu0 %v225_v1  ;;  %v230_v7 = vld [vmem:[#allocation6 + $0x28] sm:$0xff]   ;;  %v47_v8 = vand.u32 127, %v46_v6  ;;  %v231_v9 = vld [vmem:[#allocation6 + $0x30] sm:$0xff]   ;;  %v232_v10 = vld [vmem:[#allocation6 + $0x38] sm:$0xff]   ;;  %s171_s6 = sshll.u32 %s311_s1, 4  ;;  %s172_s6 = int_to_ptr.vmem [resolvable:$true] %s171_s6 }
  0x29   :  { %200 = vmatprep.subr.bf16.mxu0 %v309_v0  ;;  %v44_v11 = vld [vmem:[#allocation3] sm:$0xf]  ;;  %s277_s7 = scalar_lea.vmem %s172_s6, 128  ;;  %p282_p3 = scmp.lt.s32.totalorder %s172_s6, %s172_s6 }
  0x2a   :  { %vm50_vm1 = vcmp.lt.s32.totalorder %v47_v8, 8  ;;  %p278_p2 = scmp.ne.s32.totalorder %s172_s6, %s277_s7  ;;  %p283_p4 = scmp.lt.s32.totalorder %s277_s7, %s277_s7 }
  0x2b   :  { %vm51_vm2 = vmpackc.low %vm50_vm1, %vm50_vm1 }
  0x2c   :  { %201 = vmatpush3.bf16.msra.mxu0 %v226_v2  ;;  %v52_v12 = vsel %vm51_vm2, %v44_v11, 0  ;;  %p284_p5 = por %p283_p4, %p282_p3 }
  0x2d   :  { %202 = vmatprep.subr.bf16.mxu0 %v309_v0 }
  0x2e   :  { %p285_p6 = pnand %p284_p5, %p278_p2 }
  0x30   :  { %203 = vmatpush3.bf16.msra.mxu0 %v227_v3 }
  0x31   :  { %204 = vmatprep.subr.bf16.mxu0 %v309_v0 }
  0x34   :  { %205 = vmatpush3.bf16.msra.mxu0 %v228_v4 }
  0x35   :  { %206 = vmatprep.subr.bf16.mxu0 %v309_v0 }
  0x38   :  { %207 = vmatpush3.bf16.msra.mxu0 %v229_v5 }
  0x39   :  { %208 = vmatprep.subr.bf16.mxu0 %v309_v0 }
  0x3c   :  { %209 = vmatpush3.bf16.msra.mxu0 %v230_v7 }
  0x3d   :  { %210 = vmatprep.subr.bf16.mxu0 %v309_v0 }
  0x40   :  { %211 = vmatpush3.bf16.msra.mxu0 %v231_v9 }
  0x41   :  { %212 = vmatprep.subr.bf16.mxu0 %v309_v0 }
  0x44   :  { %213 = vmatpush3.bf16.msra.mxu0 %v232_v10 }
  0x47   :  { %215 = vmatmul.mubr.bf16.vlgmr.msra.gmra.mrb[0].mxu0 %v52_v12 }
 0x11a   :  { %v152_v13 = vpop.f32.mrb[0].mxu0 }
 0x11b   :  { %164 = vst [vmem:[#allocation8] sm:$0xff] %v152_v13  ;;  %v216_v14 = vpop.f32.mrb[1].mxu0 }
 0x11c   :  { %v155_v15 = vpop.f32.mrb[2].mxu0 }
 0x11d   :  { %288 = shalt.err (!%p285_p6)
}
 0x11e   :  { %s289_s10 = scalar_lea.hbm %s372_s2, 128 }
 0x11f   :  { %p290_p7 = scmp.ne.s32.totalorder %s372_s2, %s289_s10  ;;  %p293_p8 = scmp.lt.u32.totalorder %s289_s10, %s372_s2 }
 0x121   :  { %p295_p9 = pnand %p293_p8, %p290_p7 }
 0x123   :  { %298 = shalt.err (!%p295_p9)
}
 0x124   :  { %174 = dma.vmem_to_hbm [thread:$0]  %s172_s6, 128, %s372_s2, [#allocation5]   ;;  %v217_v16 = vpop.f32.mrb[3].mxu0 }
 0x125   :  { %303 = dma.done.wait [#allocation5], 128  }
 0x126   :  { %304 = vsyncadd [#allocation5], 4294967168 }
 0x127   :  { %178 = vsyncpa [#allocation4], 1 }
 0x128   :  { %179 = vsyncpa [#allocation7], 1 }
 0x129   :  { %180 = vsyncpa [#allocation5], 1 }

</bundles_post_ra>
